<compile_context>
chip_gen: v7x
topology: tpu7x:2x2x1
jax: 0.10.0
libtpu: 0.0.40
codegen_flags: <defaults>
</compile_context>

<pallas_src>
import jax
import jax.numpy as jnp
from jax import lax
from jax.experimental import pallas as pl
from jax.experimental.pallas import tpu as pltpu


_MAX_BATCH_TILE = 8192   # rows per grid step (multiple of 128); VMEM-safe on v5e
_SPLIT_THRESHOLD = 4096  # above this, force >=2 grid steps (v7x megacore)
_LANE = 128


def _batch_tile(batch):
    """Rows per grid step.

    Returns either the full batch (one resident block; always layout-legal)
    or a 128-aligned tile <= _MAX_BATCH_TILE chosen so the grid has at least
    two steps (lets v7x shard the "parallel" batch axis across its 2 TCs).
    """
    if batch <= _SPLIT_THRESHOLD:
        return batch
    return min(_MAX_BATCH_TILE, _LANE * pl.cdiv(batch, 2 * _LANE))


# ----------------------------- kernels ------------------------------------


def _fwd_kernel(x_ref, wt_ref, b_ref, o_ref):
    # x: (TB, D_in)  wt: (D_in, D_lat)  b: (1, D_lat)  o: (TB, D_lat)
    acc = jnp.dot(x_ref[...], wt_ref[...], preferred_element_type=jnp.float32)
    o_ref[...] = (acc + b_ref[...].astype(jnp.float32)).astype(o_ref.dtype)


def _row_sq_sum_lane_dense(d):
    """sum(d*d, axis=-1) as a lane-dense (1, TB) MXU contraction."""
    sq = d * d                                            # (TB, D_lat) f32
    ones = jnp.ones((1, sq.shape[-1]), jnp.float32)       # (1, D_lat)
    # contract D_lat of both operands -> (1, TB): full unmasked lane stores.
    return lax.dot_general(ones, sq, (((1,), (1,)), ((), ())),
                           preferred_element_type=jnp.float32)


def _calc_dis_kernel(x1_ref, x2_ref, wt_ref, o_ref):
    # Fused: ONE matmul on (x1 - x2); the Linear bias cancels in e1 - e2.
    d = jnp.dot(x1_ref[...] - x2_ref[...], wt_ref[...],
                preferred_element_type=jnp.float32)        # (TB, D_lat)
    o_ref[...] = _row_sq_sum_lane_dense(d).astype(o_ref.dtype)   # (1, TB)


def _triplet_kernel(ref_ref, x1_ref, x2_ref, wt_ref, o_ref):
    # Fused triplet: TWO matmuls on (ref - x1) / (ref - x2); bias cancels.
    r = ref_ref[...]
    d1 = jnp.dot(r - x1_ref[...], wt_ref[...], preferred_element_type=jnp.float32)
    d2 = jnp.dot(r - x2_ref[...], wt_ref[...], preferred_element_type=jnp.float32)
    o_ref[...] = _row_sq_sum_lane_dense_diff(d1, d2).astype(o_ref.dtype)


def _row_sq_sum_lane_dense_diff(d1, d2):
    """sum(d1*d1 - d2*d2, axis=-1) as a single lane-dense (1, TB) contraction."""
    diff = d1 * d1 - d2 * d2
    ones = jnp.ones((1, diff.shape[-1]), jnp.float32)
    return lax.dot_general(ones, diff, (((1,), (1,)), ((), ())),
                           preferred_element_type=jnp.float32)


# ----------------------------- wrappers ------------------------------------


def dis_embed_forward(x, weight, bias):
    """y = x @ weight.T + bias (nn.Linear semantics, kept exact).

    x: (B, D_in); weight: (D_lat, D_in) PyTorch layout; bias: (D_lat,).
    """
    B, D_in = x.shape
    D_lat = weight.shape[0]
    tb = _batch_tile(B)
    w_t = weight.T  # (D_in, D_lat); 2 KiB transpose once, no per-step relayout
    return pl.pallas_call(
        _fwd_kernel,
        out_shape=jax.ShapeDtypeStruct((B, D_lat), x.dtype),
        grid=(pl.cdiv(B, tb),),
        in_specs=[
            pl.BlockSpec((tb, D_in), lambda i: (i, 0)),     # x: tiled over batch
            pl.BlockSpec((D_in, D_lat), lambda i: (0, 0)),  # Wt: resident
            pl.BlockSpec((1, D_lat), lambda i: (0, 0)),     # bias: resident
        ],
        out_specs=pl.BlockSpec((tb, D_lat), lambda i: (i, 0)),
        compiler_params=pltpu.CompilerParams(
            dimension_semantics=("parallel",)),
    )(x, w_t, bias.reshape(1, D_lat))


def _distance_call(kernel, xs, weight, dtype):
    """Shared wrapper: fused distance kernel with lane-dense (1, TB) output."""
    B, D_in = xs[0].shape
    D_lat = weight.shape[0]
    tb = _batch_tile(B)
    nt = pl.cdiv(B, tb)
    w_t = weight.T
    x_spec = pl.BlockSpec((tb, D_in), lambda i: (i, 0))
    out = pl.pallas_call(
        kernel,
        # (nt, tb): each grid step writes one full, unmasked lane-dense row.
        out_shape=jax.ShapeDtypeStruct((nt, tb), jnp.float32),
        grid=(nt,),
        in_specs=[x_spec] * len(xs) + [pl.BlockSpec((D_in, D_lat), lambda i: (0, 0))],
        out_specs=pl.BlockSpec((1, tb), lambda i: (i, 0)),
        compiler_params=pltpu.CompilerParams(
            dimension_semantics=("parallel",)),
    )(*xs, w_t)
    # Tail-block columns (>= B) hold values computed from out-of-bounds reads;
    # each output column depends only on its own row, so slicing is safe.
    return out.reshape(-1)[:B].astype(dtype)


def calc_dis(x1, x2, weight, bias):
    """sum((f(x1) - f(x2))^2, -1), fused into one pallas_call."""
    del bias  # cancels exactly in f(x1) - f(x2)
    return _distance_call(_calc_dis_kernel, (x1, x2), weight, x1.dtype)


def triplet_delta_dis(ref, x1, x2, weight, bias):
    """sum((f(ref)-f(x1))^2,-1) - sum((f(ref)-f(x2))^2,-1), fused."""
    del bias  # cancels exactly in both differences
    return _distance_call(_triplet_kernel, (ref, x1, x2), weight, ref.dtype)


# ------------------------------- demo --------------------------------------


if __name__ == "__main__":
    # Small shapes consistent with the module: batch=8, input_dim=32, latent_dim=16
    B, D_in, D_lat = 8, 32, 16

    key = jax.random.PRNGKey(0)
    kx, kw, kb, k1, k2, kbig = jax.random.split(key, 6)

    # PyTorch-Linear-style uniform init, bound 1/sqrt(fan_in)
    bound = 1.0 / jnp.sqrt(jnp.float32(D_in))
    weight = jax.random.uniform(kw, (D_lat, D_in), minval=-bound, maxval=bound,
                                dtype=jnp.float32)
    bias = jax.random.uniform(kb, (D_lat,), minval=-bound, maxval=bound,
                              dtype=jnp.float32)

    x = jax.random.normal(kx, (B, D_in), dtype=jnp.float32)
    x1 = jax.random.normal(k1, (B, D_in), dtype=jnp.float32)
    x2 = jax.random.normal(k2, (B, D_in), dtype=jnp.float32)

    # --- forward ---
    y = jax.block_until_ready(dis_embed_forward(x, weight, bias))
    y_ref = x @ weight.T + bias
    assert y.shape == (B, D_lat)
    assert jnp.allclose(y, y_ref, atol=1e-4, rtol=1e-4), "forward mismatch"

    # --- fused calc_dis ---
    d = jax.block_until_ready(calc_dis(x1, x2, weight, bias))
    e1_ref = x1 @ weight.T + bias
    e2_ref = x2 @ weight.T + bias
    d_ref = jnp.sum(jnp.square(e1_ref - e2_ref), -1)
    assert d.shape == (B,)
    assert jnp.allclose(d, d_ref, atol=1e-3, rtol=1e-3), "calc_dis mismatch"

    # --- fused triplet_delta_dis ---
    t = jax.block_until_ready(triplet_delta_dis(x, x1, x2, weight, bias))
    er_ref = x @ weight.T + bias
    t_ref = (jnp.sum(jnp.square(er_ref - e1_ref), -1)
             - jnp.sum(jnp.square(er_ref - e2_ref), -1))
    assert t.shape == (B,)
    assert jnp.allclose(t, t_ref, atol=1e-2, rtol=1e-3), "triplet mismatch"

    # --- larger batches: multi-step grids (megacore-friendly) + tail blocks ---
    for Bg in (10000, 3 * _MAX_BATCH_TILE):
        kg1, kg2, kg3 = jax.random.split(jax.random.fold_in(kbig, Bg), 3)
        xg = jax.random.normal(kg1, (Bg, D_in), dtype=jnp.float32)
        xg1 = jax.random.normal(kg2, (Bg, D_in), dtype=jnp.float32)
        xg2 = jax.random.normal(kg3, (Bg, D_in), dtype=jnp.float32)

        yg = jax.block_until_ready(dis_embed_forward(xg, weight, bias))
        assert jnp.allclose(yg, xg @ weight.T + bias, atol=1e-4, rtol=1e-4), \
            "tiled forward mismatch"

        eg = xg @ weight.T + bias
        eg1 = xg1 @ weight.T + bias
        eg2 = xg2 @ weight.T + bias

        dg = jax.block_until_ready(calc_dis(xg, xg1, weight, bias))
        assert dg.shape == (Bg,)
        assert jnp.allclose(dg, jnp.sum(jnp.square(eg - eg1), -1),
                            atol=1e-3, rtol=1e-3), "tiled calc_dis mismatch"

        tg = jax.block_until_ready(triplet_delta_dis(xg, xg1, xg2, weight, bias))
        tg_ref = (jnp.sum(jnp.square(eg - eg1), -1)
                  - jnp.sum(jnp.square(eg - eg2), -1))
        assert tg.shape == (Bg,)
        assert jnp.allclose(tg, tg_ref, atol=1e-2, rtol=1e-3), \
            "tiled triplet mismatch"

    print("KERNEL_OK")
</pallas_src>

<mosaic_0001>
module attributes {stable_mosaic.version = 11 : i64} {
  func.func @_fwd_kernel(%arg0: i32, %arg1: memref<8x32xf32, #tpu.memory_space<vmem>>, %arg2: memref<32x16xf32, #tpu.memory_space<vmem>>, %arg3: memref<1x16xf32, #tpu.memory_space<vmem>>, %arg4: memref<8x16xf32, #tpu.memory_space<vmem>>) attributes {dimension_semantics = [#tpu.dimension_semantics<parallel>], iteration_bounds = array<i64: 1>, scalar_prefetch = 0 : i64, scratch_operands = 0 : i64, tpu.core_type = #tpu.core_type<tc>, window_params = [{transform_indices = @transform_0, window_bounds = array<i64: 8, 32>}, {pipeline_mode = #tpu.pipeline_mode<synchronous>, transform_indices = @transform_1, window_bounds = array<i64: 32, 16>}, {pipeline_mode = #tpu.pipeline_mode<synchronous>, transform_indices = @transform_2, window_bounds = array<i64: 1, 16>}, {transform_indices = @transform_3, window_bounds = array<i64: 8, 16>}]} {
    %c0 = arith.constant 0 : index
    %c0_0 = arith.constant 0 : index
    %0 = vector.load %arg1[%c0, %c0_0] : memref<8x32xf32, #tpu.memory_space<vmem>>, vector<8x32xf32>
    %c0_1 = arith.constant 0 : index
    %c0_2 = arith.constant 0 : index
    %1 = vector.load %arg2[%c0_1, %c0_2] : memref<32x16xf32, #tpu.memory_space<vmem>>, vector<32x16xf32>
    %cst = arith.constant dense<0.000000e+00> : vector<8x16xf32>
    %2 = tpu.matmul %0, %1, %cst {dimension_numbers = #tpu.dot_dimension_numbers<[1], [0], [0], [1], [0, 0, 1, 1], [], []>} : vector<8x32xf32>, vector<32x16xf32>, vector<8x16xf32> -> vector<8x16xf32>
    %c0_3 = arith.constant 0 : index
    %c0_4 = arith.constant 0 : index
    %3 = vector.load %arg3[%c0_3, %c0_4] : memref<1x16xf32, #tpu.memory_space<vmem>>, vector<1x16xf32>
    %4 = vector.broadcast %3 : vector<1x16xf32> to vector<8x16xf32>
    %5 = arith.addf %2, %4 : vector<8x16xf32>
    %c0_5 = arith.constant 0 : index
    %c0_6 = arith.constant 0 : index
    %6 = vector.load %arg4[%c0_5, %c0_6] : memref<8x16xf32, #tpu.memory_space<vmem>>, vector<8x16xf32>
    tpu.vector_store %arg4[%c0_5, %c0_6], %5 {strides = array<i32>} : memref<8x16xf32, #tpu.memory_space<vmem>>, vector<8x16xf32>,
    return
  }
  func.func @transform_0(%arg0: i32) -> (i32, i32) {
    %c0_i32 = arith.constant 0 : i32
    %c0_i32_0 = arith.constant 0 : i32
    return %arg0, %c0_i32 : i32, i32
  }
  func.func @transform_1(%arg0: i32) -> (i32, i32) {
    %c0_i32 = arith.constant 0 : i32
    %c0_i32_0 = arith.constant 0 : i32
    %c0_i32_1 = arith.constant 0 : i32
    return %c0_i32, %c0_i32_0 : i32, i32
  }
  func.func @transform_2(%arg0: i32) -> (i32, i32) {
    %c0_i32 = arith.constant 0 : i32
    %c0_i32_0 = arith.constant 0 : i32
    %c0_i32_1 = arith.constant 0 : i32
    return %c0_i32, %c0_i32_0 : i32, i32
  }
  func.func @transform_3(%arg0: i32) -> (i32, i32) {
    %c0_i32 = arith.constant 0 : i32
    %c0_i32_0 = arith.constant 0 : i32
    return %arg0, %c0_i32 : i32, i32
  }
}

</mosaic_0001>

<bundles_post_ra>
// kernel: tpu_custom_call.1
= control target key start
LH: loop header
LB: loop body
LE: loop exit
PB: predicated region body
PF: predicated region fallthrough
CT: control target
= control target key end

     0   :  { %v169_v3 = vmov 0.0|0.0   ;;  %vm170_vm0 = vmmov 0   ;;  %v171_v6 = vmov 0.0   ;;  %s223_s0 = inlined_call_operand.vmem [shape: f32[8,32], index: 0, kind: input, shape index: {}]   ;;  %s224_s1 = inlined_call_operand.vmem [shape: f32[32,16], index: 1, kind: input, shape index: {}]   ;;  %s225_s2 = inlined_call_operand.vmem [shape: f32[1,16], index: 2, kind: input, shape index: {}]   ;;  %s226_s3 = inlined_call_operand.hbm [shape: f32[8,16], index: 3, kind: output, shape index: {}]  }
   0x1   :  { %v16_v0 = vld [vmem:[%s224_s1] sm:$0xff]  ;;  %v17_v1 = vld [vmem:[%s224_s1 + $0x8] sm:$0xff]  ;;  %v18_v2 = vld [vmem:[%s224_s1 + $0x10] sm:$0xff]  ;;  %135 = vmatprep.subr.bf16.mxu0 %v169_v3  ;;  %132 = vmatprep.mubr.msk.f32.mxu0 %vm170_vm0, %v171_v6 }
   0x2   :  { %v136_v4 = vpack.c.bf16 %v17_v1, %v16_v0  ;;  %v19_v5 = vld [vmem:[%s224_s1 + $0x18] sm:$0xff] }
   0x3   :  { %8 = vsyncpa [#allocation3], 0  ;;  %v139_v7 = vpack.c.bf16 %v19_v5, %v18_v2  ;;  %v15_v8 = vld [vmem:[%s223_s0] sm:$0xff]  ;;  %vm27_vm1 = vcmask 261120   ;;  %s172_s24 = smov [#allocation2]   ;;  %vm101_vm2 = vcmask 130048  }
   0x4   :  { %137 = vmatpush3.bf16.msra.mxu0 %v136_v4  ;;  %v117_v9 = vld [vmem:[%s225_s2] ss:$0 sm:$0xff]  ;;  %s109_s1 = sshll.u32 %s172_s24, 4  ;;  %s110_s1 = int_to_ptr.vmem [resolvable:$true] %s109_s1 }
   0x5   :  { %138 = vmatprep.subr.bf16.mxu0 %v169_v3  ;;  %s145_s25 = scalar_lea.vmem %s110_s1, 128  ;;  %p150_p1 = scmp.lt.s32.totalorder %s110_s1, %s110_s1 }
   0x6   :  { %p146_p0 = scmp.ne.s32.totalorder %s110_s1, %s145_s25  ;;  %p151_p2 = scmp.lt.s32.totalorder %s145_s25, %s145_s25 }
   0x8   :  { %140 = vmatpush3.bf16.msra.mxu0 %v139_v7  ;;  %p152_p3 = por %p151_p2, %p150_p1 }
   0xa   :  { %p153_p4 = pnand %p152_p3, %p146_p0 }
   0xb   :  { %133 = vmatmul.mubr.msk.f32.vlgmr.msra.gmra.mrb[0].mxu0 %vm27_vm1, %v15_v8 }
  0xde   :  { %v97_v10 = vpop.f32.mrb[0].mxu0 }
  0xdf   :  { %v98_v11 = vadd.f32 %v117_v9, %v97_v10  ;;  %v134_v12 = vpop.f32.mrb[1].mxu0 }
  0xe1   :  { %102 = vst.msk [vmem:[#allocation2] sm:$0xff] %vm101_vm2, %v98_v11 }
  0xe2   :  { %156 = shalt.err (!%p153_p4)
}
  0xe3   :  { %s157_s27 = scalar_lea.hbm %s226_s3, 128 }
  0xe4   :  { %p158_p5 = scmp.ne.s32.totalorder %s226_s3, %s157_s27  ;;  %p161_p6 = scmp.lt.u32.totalorder %s157_s27, %s226_s3 }
  0xe6   :  { %p163_p7 = pnand %p161_p6, %p158_p5 }
  0xe8   :  { %166 = shalt.err (!%p163_p7)
}
  0xe9   :  { %112 = dma.vmem_to_hbm [thread:$0]  %s110_s1, 128, %s226_s3, [#allocation3]  }
  0xea   :  { %167 = dma.done.wait [#allocation3], 128  }
  0xeb   :  { %168 = vsyncadd [#allocation3], 4294967168 }
  0xec   :  { %116 = vsyncpa [#allocation3], 1 }

</bundles_post_ra>
